<compile_context>
chip_gen: v5e
topology: v5e:2x2
jax: 0.10.0
libtpu: 0.0.40
codegen_flags: <defaults>
</compile_context>

<pallas_src>
import jax
import jax.numpy as jnp
from jax.experimental import pallas as pl
from jax.experimental.pallas import tpu as pltpu


def _round_up(n, m):
    return -(-n // m) * m


def sae_kernel(x_ref, we_ref, be_ref, wd_ref, bd_ref, o_ref):
    # x_ref : [tile_b, ni_pad]   bf16
    # we_ref: [ni_pad, lat_pad]  bf16  encoder weight, pre-transposed + padded
    # be_ref: [1, lat_pad]       f32   encoder bias, zero-padded
    # wd_ref: [lat_pad, ni_pad]  bf16  decoder weight, pre-transposed + padded
    # bd_ref: [1, ni_pad]        f32   decoder bias, zero-padded
    # o_ref : [tile_b, ni_pad]   f32

    # Encoder: Linear + ReLU (bf16 operands, f32 MXU accumulation).
    enc = jnp.dot(x_ref[...], we_ref[...], preferred_element_type=jnp.float32)
    enc = jnp.maximum(enc + be_ref[...], 0.0)

    # Decoder: Linear.
    dec = jnp.dot(enc.astype(wd_ref.dtype), wd_ref[...],
                  preferred_element_type=jnp.float32) + bd_ref[...]

    # 1 + 4*sigmoid(d) == 3 + 2*tanh(d/2): single EUP transcendental, no
    # exp(-d) -> inf intermediate.
    o_ref[...] = (3.0 + 2.0 * jnp.tanh(0.5 * dec)).astype(o_ref.dtype)


def prepare_params(w_enc, b_enc, w_dec, b_dec, *, weight_dtype=jnp.bfloat16):
    """One-time parameter prep (NOT in the per-call path).

    w_enc: [latent, num_items], w_dec: [num_items, latent]  (PyTorch [out, in]).
    Returns (we_t, be, wd_t, bd): transposed, bf16, with BOTH latent and
    num_items zero-padded to multiples of 128.  Padding is exact: padded
    encoder bias is 0 and ReLU(0)=0, padded decoder rows/cols are 0, and the
    padded output columns are sliced off by the wrapper.
    """
    latent_dim, num_items = w_enc.shape
    lat_pad = _round_up(latent_dim, 128)
    ni_pad = _round_up(num_items, 128)

    we_t = jnp.zeros((ni_pad, lat_pad), weight_dtype)
    we_t = we_t.at[:num_items, :latent_dim].set(w_enc.T.astype(weight_dtype))
    be = jnp.zeros((1, lat_pad), jnp.float32).at[:, :latent_dim].set(b_enc)

    wd_t = jnp.zeros((lat_pad, ni_pad), weight_dtype)
    wd_t = wd_t.at[:latent_dim, :num_items].set(w_dec.T.astype(weight_dtype))
    bd = jnp.zeros((1, ni_pad), jnp.float32).at[:, :num_items].set(b_dec)

    return we_t, be, wd_t, bd


def _resident_spec(shape):
    """Constant-index (VMEM-resident) block; single-buffered where supported."""
    index_map = lambda i: (0, 0)
    if hasattr(pl, "Buffered"):
        try:
            return pl.BlockSpec(shape, index_map, pipeline_mode=pl.Buffered(1))
        except TypeError:  # older jax without pipeline_mode kwarg
            pass
    return pl.BlockSpec(shape, index_map)


def sparse_autoencoder(x, we_t, be, wd_t, bd, *, batch_tile=512):
    """x: [B, num_items] f32/bf16; params from prepare_params(). Returns [B, num_items] f32."""
    B, num_items = x.shape
    ni_pad, lat_pad = we_t.shape

    # bf16 input: the MXU truncates to bf16 anyway, so the f32 HBM read buys
    # nothing; the cast fuses with x's producer under jit.
    x = x.astype(we_t.dtype)
    if ni_pad != num_items:
        # Keep all blocks (8,128)-aligned / lane-dense (unmasked stores).
        x = jnp.pad(x, ((0, 0), (0, ni_pad - num_items)))

    # Batch tile: multiple of 8 sublanes, big (mem-bound kernel wants large
    # DMAs), but keep >= 2 grid steps so v7x can use both TensorCores.
    tile = min(batch_tile, _round_up(B, 8))
    if B > 8:
        tile = min(tile, _round_up(pl.cdiv(B, 2), 8))
    grid = (pl.cdiv(B, tile),)  # ragged last block: OOB rows are never written

    # Explicit VMEM budget: single-buffered weights + double-buffered x / out
    # tiles + f32 intermediates, with ~25% slack.
    vmem_bytes = (
        we_t.size * 2 + wd_t.size * 2            # bf16 weights (single-buffered)
        + (be.size + bd.size) * 4                # biases
        + 2 * tile * ni_pad * 2                  # x tile, bf16, double-buffered
        + 2 * tile * ni_pad * 4                  # out tile, f32, double-buffered
        + tile * (lat_pad + ni_pad) * 4          # enc / dec f32 intermediates
    )
    vmem_limit = max(32 << 20, min(int(vmem_bytes * 1.25) + (2 << 20), 120 << 20))

    out = pl.pallas_call(
        sae_kernel,
        out_shape=jax.ShapeDtypeStruct((B, ni_pad), jnp.float32),
        grid=grid,
        in_specs=[
            pl.BlockSpec((tile, ni_pad), lambda i: (i, 0)),   # batch-tiled x
            _resident_spec((ni_pad, lat_pad)),                # encoder weight
            _resident_spec((1, lat_pad)),                     # encoder bias
            _resident_spec((lat_pad, ni_pad)),                # decoder weight
            _resident_spec((1, ni_pad)),                      # decoder bias
        ],
        out_specs=pl.BlockSpec((tile, ni_pad), lambda i: (i, 0)),
        compiler_params=pltpu.CompilerParams(
            dimension_semantics=("parallel",),
            vmem_limit_bytes=vmem_limit),
    )(x, we_t, be, wd_t, bd)

    return out[:, :num_items] if ni_pad != num_items else out


def sparse_autoencoder_ref(x, w_enc, b_enc, w_dec, b_dec):
    enc = jnp.maximum(x @ w_enc.T + b_enc, 0.0)
    dec = enc @ w_dec.T + b_dec
    return 1.0 + 4.0 * jax.nn.sigmoid(dec)


if __name__ == "__main__":
    # Deterministic synthetic setup (no checkpoint / file loading).
    batch = 256        # 2 batch tiles -> real multi-step "parallel" grid
    num_items = 256    # stands in for np.load('num_items.npy').item()
    latent_dim = 100   # matches the module's latent_dim (padded to 128 inside)

    key = jax.random.PRNGKey(0)
    kx, kwe, kbe, kwd, kbd = jax.random.split(key, 5)

    x = jax.random.uniform(kx, (batch, num_items), dtype=jnp.float32)

    # Deterministic init mimicking nn.Linear's U(-1/sqrt(fan_in), 1/sqrt(fan_in)).
    bound_e = 1.0 / jnp.sqrt(jnp.float32(num_items))
    w_enc = jax.random.uniform(kwe, (latent_dim, num_items), jnp.float32,
                               -bound_e, bound_e)
    b_enc = jax.random.uniform(kbe, (latent_dim,), jnp.float32,
                               -bound_e, bound_e)

    bound_d = 1.0 / jnp.sqrt(jnp.float32(latent_dim))
    w_dec = jax.random.uniform(kwd, (num_items, latent_dim), jnp.float32,
                               -bound_d, bound_d)
    b_dec = jax.random.uniform(kbd, (num_items,), jnp.float32,
                               -bound_d, bound_d)

    # One-time parameter prep (transpose, 128-padding, bf16 cast).
    params = prepare_params(w_enc, b_enc, w_dec, b_dec)

    fwd = jax.jit(lambda xb: sparse_autoencoder(xb, *params))
    out = jax.block_until_ready(fwd(x))

    ref = sparse_autoencoder_ref(x, w_enc, b_enc, w_dec, b_dec)
    assert out.shape == (batch, num_items)
    max_err = float(jnp.max(jnp.abs(out - ref)))
    # bf16 weights + bf16 activations -> loosened tolerance (output range [1, 5]).
    assert max_err < 5e-2, f"mismatch vs reference: max abs err {max_err}"

    print("KERNEL_OK")
</pallas_src>

<mosaic_0001>
module attributes {stable_mosaic.version = 11 : i64} {
  func.func @sae_kernel(%arg0: i32, %arg1: memref<128x256xbf16, #tpu.memory_space<vmem>>, %arg2: memref<256x128xbf16, #tpu.memory_space<vmem>>, %arg3: memref<1x128xf32, #tpu.memory_space<vmem>>, %arg4: memref<128x256xbf16, #tpu.memory_space<vmem>>, %arg5: memref<1x256xf32, #tpu.memory_space<vmem>>, %arg6: memref<128x256xf32, #tpu.memory_space<vmem>>) attributes {dimension_semantics = [#tpu.dimension_semantics<parallel>], iteration_bounds = array<i64: 2>, scalar_prefetch = 0 : i64, scratch_operands = 0 : i64, tpu.core_type = #tpu.core_type<tc>, window_params = [{transform_indices = @transform_0, window_bounds = array<i64: 128, 256>}, {pipeline_mode = #tpu.pipeline_mode<synchronous>, transform_indices = @transform_1, window_bounds = array<i64: 256, 128>}, {pipeline_mode = #tpu.pipeline_mode<synchronous>, transform_indices = @transform_2, window_bounds = array<i64: 1, 128>}, {pipeline_mode = #tpu.pipeline_mode<synchronous>, transform_indices = @transform_3, window_bounds = array<i64: 128, 256>}, {pipeline_mode = #tpu.pipeline_mode<synchronous>, transform_indices = @transform_4, window_bounds = array<i64: 1, 256>}, {transform_indices = @transform_5, window_bounds = array<i64: 128, 256>}]} {
    %c0 = arith.constant 0 : index
    %c0_0 = arith.constant 0 : index
    %0 = vector.load %arg1[%c0, %c0_0] : memref<128x256xbf16, #tpu.memory_space<vmem>>, vector<128x256xbf16>
    %c0_1 = arith.constant 0 : index
    %c0_2 = arith.constant 0 : index
    %1 = vector.load %arg2[%c0_1, %c0_2] : memref<256x128xbf16, #tpu.memory_space<vmem>>, vector<256x128xbf16>
    %cst = arith.constant dense<0.000000e+00> : vector<128x128xf32>
    %2 = tpu.matmul %0, %1, %cst {dimension_numbers = #tpu.dot_dimension_numbers<[1], [0], [0], [1], [0, 0, 1, 1], [], []>} : vector<128x256xbf16>, vector<256x128xbf16>, vector<128x128xf32> -> vector<128x128xf32>
    %c0_3 = arith.constant 0 : index
    %c0_4 = arith.constant 0 : index
    %3 = vector.load %arg3[%c0_3, %c0_4] : memref<1x128xf32, #tpu.memory_space<vmem>>, vector<1x128xf32>
    %4 = vector.broadcast %3 : vector<1x128xf32> to vector<128x128xf32>
    %5 = arith.addf %2, %4 : vector<128x128xf32>
    %cst_5 = arith.constant 0.000000e+00 : f32
    %6 = vector.broadcast %cst_5 : f32 to vector<128x128xf32>
    %7 = arith.maximumf %5, %6 : vector<128x128xf32>
    %8 = arith.truncf %7 : vector<128x128xf32> to vector<128x128xbf16>
    %c0_6 = arith.constant 0 : index
    %c0_7 = arith.constant 0 : index
    %9 = vector.load %arg4[%c0_6, %c0_7] : memref<128x256xbf16, #tpu.memory_space<vmem>>, vector<128x256xbf16>
    %cst_8 = arith.constant dense<0.000000e+00> : vector<128x256xf32>
    %10 = tpu.matmul %8, %9, %cst_8 {dimension_numbers = #tpu.dot_dimension_numbers<[1], [0], [0], [1], [0, 0, 1, 1], [], []>} : vector<128x128xbf16>, vector<128x256xbf16>, vector<128x256xf32> -> vector<128x256xf32>
    %c0_9 = arith.constant 0 : index
    %c0_10 = arith.constant 0 : index
    %11 = vector.load %arg5[%c0_9, %c0_10] : memref<1x256xf32, #tpu.memory_space<vmem>>, vector<1x256xf32>
    %12 = vector.broadcast %11 : vector<1x256xf32> to vector<128x256xf32>
    %13 = arith.addf %10, %12 : vector<128x256xf32>
    %cst_11 = arith.constant 5.000000e-01 : f32
    %14 = vector.broadcast %cst_11 : f32 to vector<128x256xf32>
    %15 = arith.mulf %14, %13 : vector<128x256xf32>
    %16 = math.tanh %15 : vector<128x256xf32>
    %cst_12 = arith.constant 2.000000e+00 : f32
    %17 = vector.broadcast %cst_12 : f32 to vector<128x256xf32>
    %18 = arith.mulf %17, %16 : vector<128x256xf32>
    %cst_13 = arith.constant 3.000000e+00 : f32
    %19 = vector.broadcast %cst_13 : f32 to vector<128x256xf32>
    %20 = arith.addf %19, %18 : vector<128x256xf32>
    %c0_14 = arith.constant 0 : index
    %c0_15 = arith.constant 0 : index
    %21 = vector.load %arg6[%c0_14, %c0_15] : memref<128x256xf32, #tpu.memory_space<vmem>>, vector<128x256xf32>
    tpu.vector_store %arg6[%c0_14, %c0_15], %20 {strides = array<i32>} : memref<128x256xf32, #tpu.memory_space<vmem>>, vector<128x256xf32>,
    return
  }
  func.func @transform_0(%arg0: i32) -> (i32, i32) {
    %c0_i32 = arith.constant 0 : i32
    %c0_i32_0 = arith.constant 0 : i32
    return %arg0, %c0_i32 : i32, i32
  }
  func.func @transform_1(%arg0: i32) -> (i32, i32) {
    %c0_i32 = arith.constant 0 : i32
    %c0_i32_0 = arith.constant 0 : i32
    %c0_i32_1 = arith.constant 0 : i32
    return %c0_i32, %c0_i32_0 : i32, i32
  }
  func.func @transform_2(%arg0: i32) -> (i32, i32) {
    %c0_i32 = arith.constant 0 : i32
    %c0_i32_0 = arith.constant 0 : i32
    %c0_i32_1 = arith.constant 0 : i32
    return %c0_i32, %c0_i32_0 : i32, i32
  }
  func.func @transform_3(%arg0: i32) -> (i32, i32) {
    %c0_i32 = arith.constant 0 : i32
    %c0_i32_0 = arith.constant 0 : i32
    %c0_i32_1 = arith.constant 0 : i32
    return %c0_i32, %c0_i32_0 : i32, i32
  }
  func.func @transform_4(%arg0: i32) -> (i32, i32) {
    %c0_i32 = arith.constant 0 : i32
    %c0_i32_0 = arith.constant 0 : i32
    %c0_i32_1 = arith.constant 0 : i32
    return %c0_i32, %c0_i32_0 : i32, i32
  }
  func.func @transform_5(%arg0: i32) -> (i32, i32) {
    %c0_i32 = arith.constant 0 : i32
    %c0_i32_0 = arith.constant 0 : i32
    return %arg0, %c0_i32 : i32, i32
  }
}

</mosaic_0001>

<bundles_post_ra>
// kernel: _lambda_.1
= control target key start
LH: loop header
LB: loop body
LE: loop exit
PB: predicated region body
PF: predicated region fallthrough
CT: control target
= control target key end

     0   :  { %10 = vsyncpa [#allocation3], 0  ;;  %s1838_s0 = inlined_call_operand.vmem [shape: bf16[256,256], index: 0, kind: input, shape index: {}]   ;;  %s1839_s1 = inlined_call_operand.vmem [shape: bf16[256,128], index: 1, kind: input, shape index: {}]   ;;  %s1840_s2 = inlined_call_operand.vmem [shape: f32[1,128], index: 2, kind: input, shape index: {}]   ;;  %s1841_s3 = inlined_call_operand.vmem [shape: bf16[128,256], index: 3, kind: input, shape index: {}]   ;;  %s1842_s4 = inlined_call_operand.vmem [shape: f32[1,256], index: 4, kind: input, shape index: {}]   ;;  %s1843_s5 = inlined_call_operand.hbm [shape: f32[256,256], index: 5, kind: output, shape index: {}]  }
   0x1   :  { %12 = vsyncpa [#allocation3 + $0x1], 0  ;;  %s1477_s18 = smov 0   ;;  %s1479_s19 = smov 0  }
   0x2   :  { %s1481_s20 = smov 0   ;;  %s1483_s21 = smov 0  }
   0x3 LB: > { %s1498_s22 = sadd.s32 4294967295, %s1443_s21   ;;  %s1018_s23 = sadd.s32 4294967294, %s1443_s21   ;;  %s1443_s21 = sphi %s1483_s21, %s1849_s21   ;;  %s1439_s20 = sphi %s1481_s20, %s1848_s20   ;;  %s1435_s19 = sphi %s1479_s19, %s1847_s19   ;;  %s1431_s18 = sphi %s1477_s18, %s1846_s18  }
   0x4   : > { %s1502_s24 = sadd.s32 1, %s1443_s21   ;;  %s135_s25 = sadd.s32 1, %s1439_s20 }
   0x5   : > { %s132_s26 = ssub.s32 %s1443_s21, %s1502_s24  ;;  %p145_p0 = scmp.ne.s32.totalorder %s1439_s20, %s1435_s19 }
   0x6   : > { %p133_p1 = scmp.eq.s32.totalorder %s132_s26, 0  ;;  %p146_p2 = scmp.eq.s32.totalorder %s1498_s22, 1 }
   0x7   : > { %p151_p3 = scmp.ne.s32.totalorder %s1435_s19, %s1431_s18  ;;  %p152_p4 = scmp.eq.s32.totalorder %s1018_s23, 1 }
   0x8   : > { %s1513_s27 = scalar_select %p133_p1, %s1439_s20, %s135_s25  }
   0x9   : > { %p1515_p5 = por %p146_p2, %p145_p0  ;;  %p1519_p6 = por %p152_p4, %p151_p3 }
   0xa   : > { %p1021_p7 = scmp.ge.s32.totalorder %s1443_s21, 1  ;;  %p192_p8 = scmp.lt.s32.totalorder %s1443_s21, 3 }
   0xc   : > { %p193_p9 = pnand %p1021_p7, %p192_p8 }
   0xd   : > { %s1023_s17 = sshll.u32 (!%p193_p9), %s1498_s22, 4  ;;  %s218_s23 = sand.u32 (!%p193_p9), 1, %s1435_s19  }
   0xe   : > { %196 = sbr.rel (%p193_p9) target bundleno = 465 (0x1d1), region = 40  ;;  %p222_p10 = scmp.lt.s32.totalorder (!%p193_p9), %s1023_s17, 31 }
   0xf   : > { %s1022_s25 = sshll.u32 (!%p193_p9), %s218_s23, 8  ;;  %s1274_s30 = sshll.u32 (!%p193_p9), %s1498_s22, 8 }
  0x10   : > { %s1742_s26 = scalar_lea.vmem (!%p193_p9), [#allocation2], %s1022_s25  ;;  %s940_s22 = scalar_lea.sflag (!%p193_p9), [#allocation3], %s218_s23 }
  0x11   : > { %s953_s9 = sshll.u32 (!%p193_p9), %s1742_s26, 4  ;;  %s1401_s15 = scalar_lea.hbm (!%p193_p9), %s1843_s5, 512  ;;  %s954_s9 = int_to_ptr.vmem [resolvable:$true] %s953_s9 }
  0x13   : > { %v1248_v0 = vld [vmem:[%s1839_s1 + $0x38] sm:$0xff]  ;;  %v1247_v2 = vld [vmem:[%s1839_s1 + $0x30] sm:$0xff]  ;;  %v1246_v4 = vld [vmem:[%s1839_s1 + $0x28] sm:$0xff]  ;;  %s1851_s17 = smov (!%p222_p10, %s1023_s17), 31 }
  0x14   : > { %v1256_v1 = vld [vmem:[%s1839_s1 + $0x78] sm:$0xff]  ;;  %457 = vmatpush.bf16.msra.mxu0 %v1248_v0  ;;  %v1255_v3 = vld [vmem:[%s1839_s1 + $0x70] sm:$0xff]  ;;  %v1254_v5 = vld [vmem:[%s1839_s1 + $0x68] sm:$0xff]  ;;  %s1224_s14 = sshll.u32 %s1851_s17, 3  ;;  %s952_s17 = scalar_lea.hbm %s1843_s5, %s1274_s30 }
  0x15   : > { %506 = vmatpush.bf16.msra.mxu1 %v1256_v1  ;;  %v1245_v6 = vld [vmem:[%s1839_s1 + $0x20] sm:$0xff]  ;;  %v1244_v8 = vld [vmem:[%s1839_s1 + $0x18] sm:$0xff]  ;;  %v1243_v10 = vld [vmem:[%s1839_s1 + $0x10] sm:$0xff]  ;;  %s1571_s6 = scalar_lea.vmem %s1838_s0, %s1224_s14  ;;  %s955_s10 = sshll.u32 %s952_s17, 4  ;;  %s956_s10 = int_to_ptr.hbm [resolvable:$true] %s955_s10 }
  0x16   : > { %v1253_v7 = vld [vmem:[%s1839_s1 + $0x60] sm:$0xff]  ;;  %v1252_v9 = vld [vmem:[%s1839_s1 + $0x58] sm:$0xff]  ;;  %v1251_v11 = vld [vmem:[%s1839_s1 + $0x50] sm:$0xff]  ;;  %s1395_s11 = sshra.s32 %s956_s10, 4  ;;  %s1396_s11 = int_to_ptr.hbm [resolvable:$true] %s1395_s11 }
  0x17   : > { %v1242_v12 = vld [vmem:[%s1839_s1 + $0x8] sm:$0xff]  ;;  %v1241_v14 = vld [vmem:[%s1839_s1] sm:$0xff]  ;;  %v1036_v22 = vld [vmem:[%s1571_s6 + $0x10] sm:$0xf]  ;;  %s1397_s12 = scalar_lea.hbm %s1396_s11, 256  ;;  %p1402_p0 = scmp.lt.s32.totalorder %s1396_s11, %s1843_s5 }
  0x18   : > { %458 = vmatpush.bf16.msra.mxu0 %v1247_v2  ;;  %v1250_v13 = vld [vmem:[%s1839_s1 + $0x48] sm:$0xff]  ;;  %v1249_v15 = vld [vmem:[%s1839_s1 + $0x40] sm:$0xff]  ;;  %v1228_v23 = vld [vmem:[%s1571_s6 + $0x14] sm:$0xf0]  ;;  %p1398_p11 = scmp.ne.s32.totalorder %s1396_s11, %s1397_s12  ;;  %p1403_p1 = scmp.lt.s32.totalorder %s1401_s15, %s1397_s12 }
  0x19   : > { %507 = vmatpush.bf16.msra.mxu1 %v1255_v3  ;;  %v1028_v16 = vld [vmem:[%s1571_s6] sm:$0xf]  ;;  %v1226_v17 = vld [vmem:[%s1571_s6 + $0x4] sm:$0xf0]  ;;  %v1225_v18 = vld [vmem:[%s1571_s6 + $0x4] sm:$0xf]  ;;  %v1037_v26 = vor.u32 %v1228_v23, %v1036_v22 }
  0x1a   : > { %v1030_v19 = vld [vmem:[%s1571_s6 + $0x8] sm:$0xf0]  ;;  %v1029_v20 = vor.u32 %v1226_v17, %v1028_v16  ;;  %v1227_v24 = vld [vmem:[%s1571_s6 + $0x14] sm:$0xf]  ;;  %v1038_v25 = vld [vmem:[%s1571_s6 + $0x18] sm:$0xf0]  ;;  %p1399_p12 = pnand %p1398_p11, %p1515_p5  ;;  %p1404_p2 = por %p1403_p1, %p1402_p0 }
  0x1b   : > { %v1033_v21 = vor.u32 %v1225_v18, %v1030_v19  ;;  %v1041_v27 = vor.u32 %v1227_v24, %v1038_v25  ;;  %v1044_v28 = vld [vmem:[%s1571_s6 + $0x20] sm:$0xf]  ;;  %v1230_v29 = vld [vmem:[%s1571_s6 + $0x24] sm:$0xf0]  ;;  %v1229_v30 = vld [vmem:[%s1571_s6 + $0x24] sm:$0xf] }
  0x1c   : > { %459 = vmatpush.bf16.msra.mxu0 %v1246_v4  ;;  %v1046_v31 = vld [vmem:[%s1571_s6 + $0x28] sm:$0xf0]  ;;  %v1045_v32 = vor.u32 %v1230_v29, %v1044_v28  ;;  %v1052_v34 = vld [vmem:[%s1571_s6 + $0x30] sm:$0xf]  ;;  %v1232_v35 = vld [vmem:[%s1571_s6 + $0x34] sm:$0xf0]  ;;  %p1400_p13 = pneg %p1399_p12 }
  0x1d   : > { %508 = vmatpush.bf16.msra.mxu1 %v1254_v5  ;;  %v1049_v33 = vor.u32 %v1229_v30, %v1046_v31  ;;  %v1231_v36 = vld [vmem:[%s1571_s6 + $0x34] sm:$0xf]  ;;  %v1054_v37 = vld [vmem:[%s1571_s6 + $0x38] sm:$0xf0]  ;;  %v1053_v38 = vor.u32 %v1232_v35, %v1052_v34  ;;  %v1060_v40 = vld [vmem:[%s1571_s6 + $0x40] sm:$0xf] }
  0x1e   : > { %v1057_v39 = vor.u32 %v1231_v36, %v1054_v37  ;;  %v1234_v41 = vld [vmem:[%s1571_s6 + $0x44] sm:$0xf0]  ;;  %v1233_v42 = vld [vmem:[%s1571_s6 + $0x44] sm:$0xf]  ;;  %v1062_v43 = vld [vmem:[%s1571_s6 + $0x48] sm:$0xf0]  ;;  %p1405_p3 = pnand %p1404_p2, %p1400_p13 }
  0x1f   : > { %v1061_v44 = vor.u32 %v1234_v41, %v1060_v40  ;;  %v1065_v45 = vor.u32 %v1233_v42, %v1062_v43  ;;  %v1212_v46 = vld [vmem:[%s1841_s3 + $0x70] sm:$0xf]  ;;  %v1272_v47 = vld [vmem:[%s1841_s3 + $0x74] sm:$0xf0]  ;;  %v1271_v48 = vld [vmem:[%s1841_s3 + $0x74] sm:$0xf] }
  0x20   : > { %460 = vmatpush.bf16.msra.mxu0 %v1245_v6  ;;  %v1213_v49 = vor.u32 %v1272_v47, %v1212_v46  ;;  %v1214_v50 = vld [vmem:[%s1841_s3 + $0x78] sm:$0xf0]  ;;  %v1068_v52 = vld [vmem:[%s1571_s6 + $0x50] sm:$0xf]  ;;  %v1236_v53 = vld [vmem:[%s1571_s6 + $0x54] sm:$0xf0] }
  0x21   : > { %509 = vmatpush.bf16.msra.mxu1 %v1253_v7  ;;  %v1217_v51 = vor.u32 %v1271_v48, %v1214_v50  ;;  %v1235_v54 = vld [vmem:[%s1571_s6 + $0x54] sm:$0xf]  ;;  %v1070_v55 = vld [vmem:[%s1571_s6 + $0x58] sm:$0xf0]  ;;  %v1069_v56 = vor.u32 %v1236_v53, %v1068_v52  ;;  %v1204_v58 = vld [vmem:[%s1841_s3 + $0x60] sm:$0xf] }
  0x22   : > { %681 = vmatpush.bf16.msra.mxu2 %v1213_v49  ;;  %v1073_v57 = vor.u32 %v1235_v54, %v1070_v55  ;;  %v1270_v59 = vld [vmem:[%s1841_s3 + $0x64] sm:$0xf0]  ;;  %v1269_v60 = vld [vmem:[%s1841_s3 + $0x64] sm:$0xf]  ;;  %v1206_v62 = vld [vmem:[%s1841_s3 + $0x68] sm:$0xf0] }
  0x23   : > { %730 = vmatpush.bf16.msra.mxu3 %v1217_v51  ;;  %v1205_v61 = vor.u32 %v1270_v59, %v1204_v58  ;;  %v1196_v63 = vld [vmem:[%s1841_s3 + $0x50] sm:$0xf]  ;;  %v1268_v0 = vld [vmem:[%s1841_s3 + $0x54] sm:$0xf0]  ;;  %v1209_v1 = vor.u32 %v1269_v60, %v1206_v62  ;;  %v1267_v2 = vld [vmem:[%s1841_s3 + $0x54] sm:$0xf] }
  0x24   : > { %461 = vmatpush.bf16.msra.mxu0 %v1244_v8  ;;  %v1198_v3 = vld [vmem:[%s1841_s3 + $0x58] sm:$0xf0]  ;;  %v1197_v4 = vor.u32 %v1268_v0, %v1196_v63  ;;  %v1188_v6 = vld [vmem:[%s1841_s3 + $0x40] sm:$0xf]  ;;  %v1266_v7 = vld [vmem:[%s1841_s3 + $0x44] sm:$0xf0] }
  0x25   : > { %510 = vmatpush.bf16.msra.mxu1 %v1252_v9  ;;  %v1201_v5 = vor.u32 %v1267_v2, %v1198_v3  ;;  %v1265_v8 = vld [vmem:[%s1841_s3 + $0x44] sm:$0xf]  ;;  %v1190_v9 = vld [vmem:[%s1841_s3 + $0x48] sm:$0xf0]  ;;  %v1180_v18 = vld [vmem:[%s1841_s3 + $0x30] sm:$0xf] }
  0x26   : > { %682 = vmatpush.bf16.msra.mxu2 %v1205_v61  ;;  %v1264_v19 = vld [vmem:[%s1841_s3 + $0x34] sm:$0xf0]  ;;  %v1182_v22 = vld [vmem:[%s1841_s3 + $0x38] sm:$0xf0]  ;;  %v1172_v24 = vld [vmem:[%s1841_s3 + $0x20] sm:$0xf] }
  0x27   : > { %731 = vmatpush.bf16.msra.mxu3 %v1209_v1  ;;  %v1262_v25 = vld [vmem:[%s1841_s3 + $0x24] sm:$0xf0]  ;;  %v1174_v28 = vld [vmem:[%s1841_s3 + $0x28] sm:$0xf0]  ;;  %v1164_v30 = vld [vmem:[%s1841_s3 + $0x10] sm:$0xf] }
  0x28   : > { %462 = vmatpush.bf16.msra.mxu0 %v1243_v10  ;;  %v1189_v10 = vor.u32 %v1266_v7, %v1188_v6  ;;  %v1260_v31 = vld [vmem:[%s1841_s3 + $0x14] sm:$0xf0]  ;;  %v1166_v34 = vld [vmem:[%s1841_s3 + $0x18] sm:$0xf0]  ;;  %v1084_v36 = vld [vmem:[%s1571_s6 + $0x70] sm:$0xf] }
  0x29   : > { %511 = vmatpush.bf16.msra.mxu1 %v1251_v11  ;;  %v1076_v11 = vld [vmem:[%s1571_s6 + $0x60] sm:$0xf]  ;;  %v1240_v37 = vld [vmem:[%s1571_s6 + $0x74] sm:$0xf0]  ;;  %v1257_v40 = vld [vmem:[%s1841_s3 + $0x4] sm:$0xf] }
  0x2a   : > { %683 = vmatpush.bf16.msra.mxu2 %v1197_v4  ;;  %v1239_v41 = vld [vmem:[%s1571_s6 + $0x74] sm:$0xf]  ;;  %v1086_v42 = vld [vmem:[%s1571_s6 + $0x78] sm:$0xf0]  ;;  %v1085_v46 = vor.u32 %v1240_v37, %v1084_v36  ;;  %v1710_v50 = vld [vmem:[%s1840_s2] ss:$0 sm:$0xff] }
  0x2b   : > { %732 = vmatpush.bf16.msra.mxu3 %v1201_v5  ;;  %v1089_v47 = vor.u32 %v1239_v41, %v1086_v42 }
  0x2c   : > { %463 = vmatpush.bf16.msra.mxu0 %v1242_v12  ;;  %v1193_v12 = vor.u32 %v1265_v8, %v1190_v9 }
  0x2d   : > { %512 = vmatpush.bf16.msra.mxu1 %v1250_v13  ;;  %v1238_v13 = vld [vmem:[%s1571_s6 + $0x64] sm:$0xf0] }
  0x2e   : > { %684 = vmatpush.bf16.msra.mxu2 %v1189_v10  ;;  %v1077_v16 = vor.u32 %v1238_v13, %v1076_v11 }
  0x2f   : > { %733 = vmatpush.bf16.msra.mxu3 %v1193_v12 }
  0x30   : > { %464 = vmatpush.bf16.msra.mxu0 %v1241_v14  ;;  %v1237_v14 = vld [vmem:[%s1571_s6 + $0x64] sm:$0xf] }
  0x31   : > { %513 = vmatpush.bf16.msra.mxu1 %v1249_v15  ;;  %v1078_v15 = vld [vmem:[%s1571_s6 + $0x68] sm:$0xf0] }
  0x32   : > { %v1081_v17 = vor.u32 %v1237_v14, %v1078_v15 }
  0x33   : > { %465 = vmatmul.bf16.vlgmr.msra.gmra.mxu0 %v1029_v20  ;;  %v1263_v20 = vld [vmem:[%s1841_s3 + $0x34] sm:$0xf] }
  0x34   : > { %514 = vmatmul.bf16.vlgmr.msra.gmra.mxu1 %v1033_v21  ;;  %v1181_v21 = vor.u32 %v1264_v19, %v1180_v18  ;;  %v1185_v23 = vor.u32 %v1263_v20, %v1182_v22 }
  0x36   : > { %685 = vmatpush.bf16.msra.mxu2 %v1181_v21  ;;  %734 = vmatpush.bf16.msra.mxu3 %v1185_v23 }
  0x43   : > { %470 = vmatmul.bf16.gmra.mxu0 %v1037_v26  ;;  %v1261_v26 = vld [vmem:[%s1841_s3 + $0x24] sm:$0xf] }
  0x44   : > { %519 = vmatmul.bf16.gmra.mxu1 %v1041_v27  ;;  %v1173_v27 = vor.u32 %v1262_v25, %v1172_v24  ;;  %v1177_v29 = vor.u32 %v1261_v26, %v1174_v28 }
  0x46   : > { %686 = vmatpush.bf16.msra.mxu2 %v1173_v27  ;;  %735 = vmatpush.bf16.msra.mxu3 %v1177_v29 }
  0x53   : > { %475 = vmatmul.bf16.gmra.mxu0 %v1045_v32  ;;  %v1259_v32 = vld [vmem:[%s1841_s3 + $0x14] sm:$0xf] }
  0x54   : > { %524 = vmatmul.bf16.gmra.mxu1 %v1049_v33  ;;  %v1165_v33 = vor.u32 %v1260_v31, %v1164_v30  ;;  %v1169_v35 = vor.u32 %v1259_v32, %v1166_v34 }
  0x56   : > { %687 = vmatpush.bf16.msra.mxu2 %v1165_v33  ;;  %736 = vmatpush.bf16.msra.mxu3 %v1169_v35 }
  0x63   : > { %480 = vmatmul.bf16.gmra.mxu0 %v1053_v38  ;;  %v1156_v38 = vld [vmem:[%s1841_s3] sm:$0xf] }
  0x64   : > { %529 = vmatmul.bf16.gmra.mxu1 %v1057_v39  ;;  %v1258_v39 = vld [vmem:[%s1841_s3 + $0x4] sm:$0xf0] }
  0x65   : > { %v1157_v43 = vor.u32 %v1258_v39, %v1156_v38 }
  0x67   : > { %688 = vmatpush.bf16.msra.mxu2 %v1157_v43 }
  0x73   : > { %485 = vmatmul.bf16.gmra.mxu0 %v1061_v44  ;;  %v1158_v44 = vld [vmem:[%s1841_s3 + $0x8] sm:$0xf0] }
  0x74   : > { %534 = vmatmul.bf16.gmra.mxu1 %v1065_v45  ;;  %v1161_v45 = vor.u32 %v1257_v40, %v1158_v44 }
  0x76   : > { %737 = vmatpush.bf16.msra.mxu3 %v1161_v45 }
  0x83   : > { %490 = vmatmul.bf16.gmra.mxu0 %v1069_v56 }
  0x84   : > { %539 = vmatmul.bf16.gmra.mxu1 %v1073_v57 }
  0x93   : > { %495 = vmatmul.bf16.gmra.mxu0 %v1077_v16 }
  0x94   : > { %544 = vmatmul.bf16.gmra.mxu1 %v1081_v17 }
  0xa3   : > { %500 = vmatmul.bf16.gmra.mxu0 %v1085_v46 }
  0xa4   : > { %549 = vmatmul.bf16.gmra.mxu1 %v1089_v47 }
  0xb0   : > { %v466_v48 = vpop.f32.mrf.mxu0 }
  0xb1   : > { %v515_v49 = vpop.f32.mrf.mxu1  ;;  %v467_v51 = vadd.f32 %v1710_v50, %v466_v48 }
  0xb3   : > { %v516_v54 = vadd.f32 %v515_v49, %v467_v51 }
  0xb5   : > { %v555_v57 = vmax.f32 %v516_v54, 0.0 }
  0xb8   : > { %v468_v52 = vpop.f32.mrf.mxu0 }
  0xb9   : > { %v517_v53 = vpop.f32.mrf.mxu1  ;;  %v469_v55 = vadd.f32 %v1710_v50, %v468_v52 }
  0xbb   : > { %v518_v56 = vadd.f32 %v517_v53, %v469_v55 }
  0xbd   : > { %v556_v58 = vmax.f32 %v518_v56, 0.0 }
  0xbf   : > { %v571_v59 = vpack.c.bf16 %v556_v58, %v555_v57 }
  0xc0   : > { %v471_v60 = vpop.f32.mrf.mxu0 }
  0xc1   : > { %v520_v61 = vpop.f32.mrf.mxu1  ;;  %689 = vmatmul.bf16.vlgmr.msra.gmra.mxu2 %v571_v59  ;;  %738 = vmatmul.bf16.vlgmr.msra.gmra.mxu3 %v571_v59  ;;  %v472_v62 = vadd.f32 %v1710_v50, %v471_v60 }
  0xc3   : > { %v521_v1 = vadd.f32 %v520_v61, %v472_v62 }
  0xc5   : > { %v557_v4 = vmax.f32 %v521_v1, 0.0 }
  0xc8   : > { %v473_v63 = vpop.f32.mrf.mxu0 }
  0xc9   : > { %v522_v0 = vpop.f32.mrf.mxu1  ;;  %v474_v2 = vadd.f32 %v1710_v50, %v473_v63 }
  0xcb   : > { %v523_v3 = vadd.f32 %v522_v0, %v474_v2 }
  0xcd   : > { %v558_v5 = vmax.f32 %v523_v3, 0.0 }
  0xcf   : > { %v572_v6 = vpack.c.bf16 %v558_v5, %v557_v4 }
  0xd0   : > { %v476_v7 = vpop.f32.mrf.mxu0 }
  0xd1   : > { %v525_v8 = vpop.f32.mrf.mxu1  ;;  %694 = vmatmul.bf16.gmra.mxu2 %v572_v6  ;;  %743 = vmatmul.bf16.gmra.mxu3 %v572_v6  ;;  %v477_v9 = vadd.f32 %v1710_v50, %v476_v7 }
  0xd3   : > { %v526_v12 = vadd.f32 %v525_v8, %v477_v9 }
  0xd5   : > { %v559_v15 = vmax.f32 %v526_v12, 0.0 }
  0xd8   : > { %v478_v10 = vpop.f32.mrf.mxu0 }
  0xd9   : > { %v527_v11 = vpop.f32.mrf.mxu1  ;;  %v479_v13 = vadd.f32 %v1710_v50, %v478_v10  ;;  %v595_v10 = vld [vmem:[%s1842_s4] sm:$0x3] }
  0xda   : > { %v1733_v12 = vperm.slane %v595_v10, 1 }
  0xdb   : > { %v528_v14 = vadd.f32 %v527_v11, %v479_v13  ;;  %v1731_v11 = vperm.slane %v595_v10, 0 }
  0xdd   : > { %v560_v16 = vmax.f32 %v528_v14, 0.0 }
  0xdf   : > { %v573_v17 = vpack.c.bf16 %v560_v16, %v559_v15 }
  0xe0   : > { %v481_v18 = vpop.f32.mrf.mxu0 }
  0xe1   : > { %v530_v19 = vpop.f32.mrf.mxu1  ;;  %699 = vmatmul.bf16.gmra.mxu2 %v573_v17  ;;  %748 = vmatmul.bf16.gmra.mxu3 %v573_v17  ;;  %v482_v20 = vadd.f32 %v1710_v50, %v481_v18 }
  0xe3   : > { %v531_v23 = vadd.f32 %v530_v19, %v482_v20 }
  0xe5   : > { %v561_v26 = vmax.f32 %v531_v23, 0.0 }
  0xe8   : > { %v483_v21 = vpop.f32.mrf.mxu0 }
  0xe9   : > { %v532_v22 = vpop.f32.mrf.mxu1  ;;  %v484_v24 = vadd.f32 %v1710_v50, %v483_v21 }
  0xeb   : > { %v533_v25 = vadd.f32 %v532_v22, %v484_v24 }
  0xed   : > { %v562_v27 = vmax.f32 %v533_v25, 0.0 }
  0xef   : > { %v574_v28 = vpack.c.bf16 %v562_v27, %v561_v26 }
  0xf0   : > { %v486_v29 = vpop.f32.mrf.mxu0 }
  0xf1   : > { %v535_v30 = vpop.f32.mrf.mxu1  ;;  %704 = vmatmul.bf16.gmra.mxu2 %v574_v28  ;;  %753 = vmatmul.bf16.gmra.mxu3 %v574_v28  ;;  %v487_v31 = vadd.f32 %v1710_v50, %v486_v29 }
  0xf3   : > { %v536_v34 = vadd.f32 %v535_v30, %v487_v31 }
  0xf5   : > { %v563_v37 = vmax.f32 %v536_v34, 0.0 }
  0xf8   : > { %v488_v32 = vpop.f32.mrf.mxu0 }
  0xf9   : > { %v537_v33 = vpop.f32.mrf.mxu1  ;;  %v489_v35 = vadd.f32 %v1710_v50, %v488_v32 }
  0xfb   : > { %v538_v36 = vadd.f32 %v537_v33, %v489_v35 }
  0xfd   : > { %v564_v38 = vmax.f32 %v538_v36, 0.0 }
  0xff   : > { %v575_v39 = vpack.c.bf16 %v564_v38, %v563_v37 }
 0x100   : > { %v491_v40 = vpop.f32.mrf.mxu0 }
 0x101   : > { %v540_v41 = vpop.f32.mrf.mxu1  ;;  %709 = vmatmul.bf16.gmra.mxu2 %v575_v39  ;;  %758 = vmatmul.bf16.gmra.mxu3 %v575_v39  ;;  %v492_v42 = vadd.f32 %v1710_v50, %v491_v40 }
 0x103   : > { %v541_v45 = vadd.f32 %v540_v41, %v492_v42 }
 0x105   : > { %v565_v48 = vmax.f32 %v541_v45, 0.0 }
 0x108   : > { %v493_v43 = vpop.f32.mrf.mxu0 }
 0x109   : > { %v542_v44 = vpop.f32.mrf.mxu1  ;;  %v494_v46 = vadd.f32 %v1710_v50, %v493_v43 }
 0x10b   : > { %v543_v47 = vadd.f32 %v542_v44, %v494_v46 }
 0x10d   : > { %v566_v49 = vmax.f32 %v543_v47, 0.0 }
 0x10f   : > { %v576_v51 = vpack.c.bf16 %v566_v49, %v565_v48 }
 0x110   : > { %v496_v52 = vpop.f32.mrf.mxu0 }
 0x111   : > { %v545_v53 = vpop.f32.mrf.mxu1  ;;  %714 = vmatmul.bf16.gmra.mxu2 %v576_v51  ;;  %763 = vmatmul.bf16.gmra.mxu3 %v576_v51  ;;  %v497_v54 = vadd.f32 %v1710_v50, %v496_v52 }
 0x113   : > { %v546_v57 = vadd.f32 %v545_v53, %v497_v54 }
 0x115   : > { %v567_v60 = vmax.f32 %v546_v57, 0.0 }
 0x118   : > { %v498_v55 = vpop.f32.mrf.mxu0 }
 0x119   : > { %v547_v56 = vpop.f32.mrf.mxu1  ;;  %v499_v58 = vadd.f32 %v1710_v50, %v498_v55 }
 0x11b   : > { %v548_v59 = vadd.f32 %v547_v56, %v499_v58 }
 0x11d   : > { %v568_v61 = vmax.f32 %v548_v59, 0.0 }
 0x11f   : > { %v577_v62 = vpack.c.bf16 %v568_v61, %v567_v60 }
 0x120   : > { %v501_v63 = vpop.f32.mrf.mxu0 }
 0x121   : > { %v550_v0 = vpop.f32.mrf.mxu1  ;;  %719 = vmatmul.bf16.gmra.mxu2 %v577_v62  ;;  %768 = vmatmul.bf16.gmra.mxu3 %v577_v62  ;;  %v502_v1 = vadd.f32 %v1710_v50, %v501_v63 }
 0x123   : > { %v551_v3 = vadd.f32 %v550_v0, %v502_v1 }
 0x125   : > { %v569_v7 = vmax.f32 %v551_v3, 0.0 }
 0x128   : > { %v503_v2 = vpop.f32.mrf.mxu0 }
 0x129   : > { %v504_v4 = vadd.f32 %v1710_v50, %v503_v2  ;;  %v552_v5 = vpop.f32.mrf.mxu1 }
 0x12b   : > { %v553_v6 = vadd.f32 %v552_v5, %v504_v4 }
 0x12d   : > { %v570_v8 = vmax.f32 %v553_v6, 0.0 }
 0x12f   : > { %v578_v9 = vpack.c.bf16 %v570_v8, %v569_v7 }
 0x131   : > { %724 = vmatmul.bf16.gmra.mxu2 %v578_v9  ;;  %773 = vmatmul.bf16.gmra.mxu3 %v578_v9 }
 0x144   : > { %v690_v13 = vpop.f32.mrf.mxu2  ;;  %v739_v14 = vpop.f32.mrf.mxu3 }
 0x145   : > { %v691_v50 = vadd.f32 %v690_v13, %v1731_v11  ;;  %v740_v15 = vadd.f32 %v739_v14, %v1733_v12 }
 0x147   : > { %v779_v16 = vmul.f32 0.5, %v691_v50  ;;  %v780_v17 = vmul.f32 0.5, %v740_v15 }
 0x149   : > { %1317 = vtanh.f32 %v779_v16 }
 0x14a   : > { %1319 = vtanh.f32 %v780_v17 }
 0x14c   : > { %v692_v18 = vpop.f32.mrf.mxu2  ;;  %v741_v19 = vpop.f32.mrf.mxu3 }
 0x14d   : > { %v693_v20 = vadd.f32 %v692_v18, %v1731_v11  ;;  %v742_v21 = vadd.f32 %v741_v19, %v1733_v12 }
 0x14f   : > { %v1318_v22 = vpop.eup %1317  ;;  %v781_v23 = vmul.f32 0.5, %v693_v20  ;;  %v782_v24 = vmul.f32 0.5, %v742_v21 }
 0x150   : > { %v1320_v25 = vpop.eup %1319  ;;  %v843_v26 = vmul.f32 2.0, %v1318_v22 }
 0x151   : > { %v844_v27 = vmul.f32 2.0, %v1320_v25  ;;  %1321 = vtanh.f32 %v781_v23 }
 0x152   : > { %v875_v28 = vadd.f32 3.0, %v843_v26  ;;  %1323 = vtanh.f32 %v782_v24 }
 0x153   : > { %v876_v29 = vadd.f32 3.0, %v844_v27 }
 0x154   : > { %907 = vst [vmem:[%s1742_s26] sm:$0xff] %v875_v28  ;;  %v695_v30 = vpop.f32.mrf.mxu2  ;;  %v744_v31 = vpop.f32.mrf.mxu3 }
 0x155   : > { %908 = vst [vmem:[%s1742_s26 + $0x8] sm:$0xff] %v876_v29  ;;  %v696_v32 = vadd.f32 %v695_v30, %v1731_v11  ;;  %v745_v33 = vadd.f32 %v744_v31, %v1733_v12 }
 0x157   : > { %v1322_v34 = vpop.eup %1321  ;;  %v783_v35 = vmul.f32 0.5, %v696_v32  ;;  %v784_v36 = vmul.f32 0.5, %v745_v33 }
 0x158   : > { %v1324_v37 = vpop.eup %1323  ;;  %v845_v38 = vmul.f32 2.0, %v1322_v34 }
 0x159   : > { %v846_v39 = vmul.f32 2.0, %v1324_v37  ;;  %1325 = vtanh.f32 %v783_v35 }
 0x15a   : > { %v877_v40 = vadd.f32 3.0, %v845_v38  ;;  %1327 = vtanh.f32 %v784_v36 }
 0x15b   : > { %v878_v41 = vadd.f32 3.0, %v846_v39 }
 0x15c   : > { %909 = vst [vmem:[%s1742_s26 + $0x10] sm:$0xff] %v877_v40  ;;  %v697_v42 = vpop.f32.mrf.mxu2  ;;  %v746_v43 = vpop.f32.mrf.mxu3 }
 0x15d   : > { %910 = vst [vmem:[%s1742_s26 + $0x18] sm:$0xff] %v878_v41  ;;  %v698_v44 = vadd.f32 %v697_v42, %v1731_v11  ;;  %v747_v45 = vadd.f32 %v746_v43, %v1733_v12 }
 0x15f   : > { %v1326_v46 = vpop.eup %1325  ;;  %v785_v47 = vmul.f32 0.5, %v698_v44  ;;  %v786_v48 = vmul.f32 0.5, %v747_v45 }
 0x160   : > { %v1328_v49 = vpop.eup %1327  ;;  %v847_v51 = vmul.f32 2.0, %v1326_v46 }
 0x161   : > { %v848_v52 = vmul.f32 2.0, %v1328_v49  ;;  %1329 = vtanh.f32 %v785_v47 }
 0x162   : > { %v879_v53 = vadd.f32 3.0, %v847_v51  ;;  %1331 = vtanh.f32 %v786_v48 }
 0x163   : > { %v880_v54 = vadd.f32 3.0, %v848_v52 }
 0x164   : > { %911 = vst [vmem:[%s1742_s26 + $0x20] sm:$0xff] %v879_v53  ;;  %v700_v55 = vpop.f32.mrf.mxu2  ;;  %v749_v56 = vpop.f32.mrf.mxu3 }
 0x165   : > { %912 = vst [vmem:[%s1742_s26 + $0x28] sm:$0xff] %v880_v54  ;;  %v701_v57 = vadd.f32 %v700_v55, %v1731_v11  ;;  %v750_v58 = vadd.f32 %v749_v56, %v1733_v12 }
 0x167   : > { %v1330_v59 = vpop.eup %1329  ;;  %v787_v60 = vmul.f32 0.5, %v701_v57  ;;  %v788_v61 = vmul.f32 0.5, %v750_v58 }
 0x168   : > { %v1332_v62 = vpop.eup %1331  ;;  %v849_v63 = vmul.f32 2.0, %v1330_v59 }
 0x169   : > { %v850_v0 = vmul.f32 2.0, %v1332_v62  ;;  %1333 = vtanh.f32 %v787_v60 }
 0x16a   : > { %v881_v1 = vadd.f32 3.0, %v849_v63  ;;  %1335 = vtanh.f32 %v788_v61 }
 0x16b   : > { %v882_v2 = vadd.f32 3.0, %v850_v0 }
 0x16c   : > { %913 = vst [vmem:[%s1742_s26 + $0x30] sm:$0xff] %v881_v1  ;;  %v702_v3 = vpop.f32.mrf.mxu2  ;;  %v751_v4 = vpop.f32.mrf.mxu3 }
 0x16d   : > { %914 = vst [vmem:[%s1742_s26 + $0x38] sm:$0xff] %v882_v2  ;;  %v703_v5 = vadd.f32 %v702_v3, %v1731_v11  ;;  %v752_v6 = vadd.f32 %v751_v4, %v1733_v12 }
 0x16f   : > { %v1334_v7 = vpop.eup %1333  ;;  %v789_v8 = vmul.f32 0.5, %v703_v5  ;;  %v790_v9 = vmul.f32 0.5, %v752_v6 }
 0x170   : > { %v1336_v10 = vpop.eup %1335  ;;  %v851_v13 = vmul.f32 2.0, %v1334_v7 }
 0x171   : > { %v852_v14 = vmul.f32 2.0, %v1336_v10  ;;  %1337 = vtanh.f32 %v789_v8 }
 0x172   : > { %v883_v50 = vadd.f32 3.0, %v851_v13  ;;  %1339 = vtanh.f32 %v790_v9 }
 0x173   : > { %v884_v15 = vadd.f32 3.0, %v852_v14 }
 0x174   : > { %915 = vst [vmem:[%s1742_s26 + $0x40] sm:$0xff] %v883_v50  ;;  %v705_v16 = vpop.f32.mrf.mxu2  ;;  %v754_v17 = vpop.f32.mrf.mxu3 }
 0x175   : > { %916 = vst [vmem:[%s1742_s26 + $0x48] sm:$0xff] %v884_v15  ;;  %v706_v18 = vadd.f32 %v705_v16, %v1731_v11  ;;  %v755_v19 = vadd.f32 %v754_v17, %v1733_v12 }
 0x177   : > { %v1338_v20 = vpop.eup %1337  ;;  %v791_v21 = vmul.f32 0.5, %v706_v18  ;;  %v792_v22 = vmul.f32 0.5, %v755_v19 }
 0x178   : > { %v1340_v23 = vpop.eup %1339  ;;  %v853_v24 = vmul.f32 2.0, %v1338_v20 }
 0x179   : > { %v854_v25 = vmul.f32 2.0, %v1340_v23  ;;  %1341 = vtanh.f32 %v791_v21 }
 0x17a   : > { %v885_v26 = vadd.f32 3.0, %v853_v24  ;;  %1343 = vtanh.f32 %v792_v22 }
 0x17b   : > { %v886_v27 = vadd.f32 3.0, %v854_v25 }
 0x17c   : > { %917 = vst [vmem:[%s1742_s26 + $0x50] sm:$0xff] %v885_v26  ;;  %v707_v28 = vpop.f32.mrf.mxu2  ;;  %v756_v29 = vpop.f32.mrf.mxu3 }
 0x17d   : > { %918 = vst [vmem:[%s1742_s26 + $0x58] sm:$0xff] %v886_v27  ;;  %v708_v30 = vadd.f32 %v707_v28, %v1731_v11  ;;  %v757_v31 = vadd.f32 %v756_v29, %v1733_v12 }
 0x17f   : > { %v1342_v32 = vpop.eup %1341  ;;  %v793_v33 = vmul.f32 0.5, %v708_v30  ;;  %v794_v34 = vmul.f32 0.5, %v757_v31 }
 0x180   : > { %v1344_v35 = vpop.eup %1343  ;;  %v855_v36 = vmul.f32 2.0, %v1342_v32 }
 0x181   : > { %v856_v37 = vmul.f32 2.0, %v1344_v35  ;;  %1345 = vtanh.f32 %v793_v33 }
 0x182   : > { %v887_v38 = vadd.f32 3.0, %v855_v36  ;;  %1347 = vtanh.f32 %v794_v34 }
 0x183   : > { %v888_v39 = vadd.f32 3.0, %v856_v37 }
 0x184   : > { %919 = vst [vmem:[%s1742_s26 + $0x60] sm:$0xff] %v887_v38  ;;  %v710_v40 = vpop.f32.mrf.mxu2  ;;  %v759_v41 = vpop.f32.mrf.mxu3 }
 0x185   : > { %920 = vst [vmem:[%s1742_s26 + $0x68] sm:$0xff] %v888_v39  ;;  %v711_v42 = vadd.f32 %v710_v40, %v1731_v11  ;;  %v760_v43 = vadd.f32 %v759_v41, %v1733_v12 }
 0x187   : > { %v1346_v44 = vpop.eup %1345  ;;  %v795_v45 = vmul.f32 0.5, %v711_v42  ;;  %v796_v46 = vmul.f32 0.5, %v760_v43 }
 0x188   : > { %v1348_v47 = vpop.eup %1347  ;;  %v857_v48 = vmul.f32 2.0, %v1346_v44 }
 0x189   : > { %v858_v49 = vmul.f32 2.0, %v1348_v47  ;;  %1349 = vtanh.f32 %v795_v45 }
 0x18a   : > { %v889_v51 = vadd.f32 3.0, %v857_v48  ;;  %1351 = vtanh.f32 %v796_v46 }
 0x18b   : > { %v890_v52 = vadd.f32 3.0, %v858_v49 }
 0x18c   : > { %921 = vst [vmem:[%s1742_s26 + $0x70] sm:$0xff] %v889_v51  ;;  %v712_v53 = vpop.f32.mrf.mxu2  ;;  %v761_v54 = vpop.f32.mrf.mxu3 }
 0x18d   : > { %922 = vst [vmem:[%s1742_s26 + $0x78] sm:$0xff] %v890_v52  ;;  %v713_v55 = vadd.f32 %v712_v53, %v1731_v11  ;;  %v762_v56 = vadd.f32 %v761_v54, %v1733_v12 }
 0x18f   : > { %v1350_v57 = vpop.eup %1349  ;;  %v797_v58 = vmul.f32 0.5, %v713_v55  ;;  %v798_v59 = vmul.f32 0.5, %v762_v56 }
 0x190   : > { %v1352_v60 = vpop.eup %1351  ;;  %v859_v61 = vmul.f32 2.0, %v1350_v57 }
 0x191   : > { %v860_v62 = vmul.f32 2.0, %v1352_v60  ;;  %1353 = vtanh.f32 %v797_v58 }
 0x192   : > { %v891_v63 = vadd.f32 3.0, %v859_v61  ;;  %1355 = vtanh.f32 %v798_v59 }
 0x193   : > { %v892_v0 = vadd.f32 3.0, %v860_v62 }
 0x194   : > { %923 = vst [vmem:[%s1742_s26 + $0x80] sm:$0xff] %v891_v63  ;;  %v715_v1 = vpop.f32.mrf.mxu2  ;;  %v764_v2 = vpop.f32.mrf.mxu3 }
 0x195   : > { %924 = vst [vmem:[%s1742_s26 + $0x88] sm:$0xff] %v892_v0  ;;  %v716_v3 = vadd.f32 %v715_v1, %v1731_v11  ;;  %v765_v4 = vadd.f32 %v764_v2, %v1733_v12 }
 0x197   : > { %v1354_v5 = vpop.eup %1353  ;;  %v799_v6 = vmul.f32 0.5, %v716_v3  ;;  %v800_v7 = vmul.f32 0.5, %v765_v4 }
 0x198   : > { %v1356_v8 = vpop.eup %1355  ;;  %v861_v9 = vmul.f32 2.0, %v1354_v5 }
 0x199   : > { %v862_v10 = vmul.f32 2.0, %v1356_v8  ;;  %1357 = vtanh.f32 %v799_v6 }
 0x19a   : > { %v893_v13 = vadd.f32 3.0, %v861_v9  ;;  %1359 = vtanh.f32 %v800_v7 }
 0x19b   : > { %v894_v14 = vadd.f32 3.0, %v862_v10 }
 0x19c   : > { %925 = vst [vmem:[%s1742_s26 + $0x90] sm:$0xff] %v893_v13  ;;  %v717_v50 = vpop.f32.mrf.mxu2  ;;  %v766_v15 = vpop.f32.mrf.mxu3 }
 0x19d   : > { %926 = vst [vmem:[%s1742_s26 + $0x98] sm:$0xff] %v894_v14  ;;  %v718_v16 = vadd.f32 %v717_v50, %v1731_v11  ;;  %v767_v17 = vadd.f32 %v766_v15, %v1733_v12 }
 0x19f   : > { %v1358_v18 = vpop.eup %1357  ;;  %v801_v19 = vmul.f32 0.5, %v718_v16  ;;  %v802_v20 = vmul.f32 0.5, %v767_v17 }
 0x1a0   : > { %v1360_v21 = vpop.eup %1359  ;;  %v863_v22 = vmul.f32 2.0, %v1358_v18 }
 0x1a1   : > { %v864_v23 = vmul.f32 2.0, %v1360_v21  ;;  %1361 = vtanh.f32 %v801_v19 }
 0x1a2   : > { %v895_v24 = vadd.f32 3.0, %v863_v22  ;;  %1363 = vtanh.f32 %v802_v20 }
 0x1a3   : > { %v896_v25 = vadd.f32 3.0, %v864_v23 }
 0x1a4   : > { %927 = vst [vmem:[%s1742_s26 + $0xa0] sm:$0xff] %v895_v24  ;;  %v720_v26 = vpop.f32.mrf.mxu2  ;;  %v769_v27 = vpop.f32.mrf.mxu3 }
 0x1a5   : > { %928 = vst [vmem:[%s1742_s26 + $0xa8] sm:$0xff] %v896_v25  ;;  %v721_v28 = vadd.f32 %v720_v26, %v1731_v11  ;;  %v770_v29 = vadd.f32 %v769_v27, %v1733_v12 }
 0x1a7   : > { %v1362_v30 = vpop.eup %1361  ;;  %v803_v31 = vmul.f32 0.5, %v721_v28  ;;  %v804_v32 = vmul.f32 0.5, %v770_v29 }
 0x1a8   : > { %v1364_v33 = vpop.eup %1363  ;;  %v865_v34 = vmul.f32 2.0, %v1362_v30 }
 0x1a9   : > { %v866_v35 = vmul.f32 2.0, %v1364_v33  ;;  %1365 = vtanh.f32 %v803_v31 }
 0x1aa   : > { %v897_v36 = vadd.f32 3.0, %v865_v34  ;;  %1367 = vtanh.f32 %v804_v32 }
 0x1ab   : > { %v898_v37 = vadd.f32 3.0, %v866_v35 }
 0x1ac   : > { %929 = vst [vmem:[%s1742_s26 + $0xb0] sm:$0xff] %v897_v36  ;;  %v722_v38 = vpop.f32.mrf.mxu2  ;;  %v771_v39 = vpop.f32.mrf.mxu3 }
 0x1ad   : > { %930 = vst [vmem:[%s1742_s26 + $0xb8] sm:$0xff] %v898_v37  ;;  %v723_v40 = vadd.f32 %v722_v38, %v1731_v11  ;;  %v772_v41 = vadd.f32 %v771_v39, %v1733_v12 }
 0x1af   : > { %v1366_v42 = vpop.eup %1365  ;;  %v805_v43 = vmul.f32 0.5, %v723_v40  ;;  %v806_v44 = vmul.f32 0.5, %v772_v41 }
 0x1b0   : > { %v1368_v45 = vpop.eup %1367  ;;  %v867_v46 = vmul.f32 2.0, %v1366_v42 }
 0x1b1   : > { %v868_v47 = vmul.f32 2.0, %v1368_v45  ;;  %1369 = vtanh.f32 %v805_v43 }
 0x1b2   : > { %v899_v48 = vadd.f32 3.0, %v867_v46  ;;  %1371 = vtanh.f32 %v806_v44 }
 0x1b3   : > { %v900_v49 = vadd.f32 3.0, %v868_v47 }
 0x1b4   : > { %931 = vst [vmem:[%s1742_s26 + $0xc0] sm:$0xff] %v899_v48  ;;  %v725_v51 = vpop.f32.mrf.mxu2  ;;  %v774_v52 = vpop.f32.mrf.mxu3 }
 0x1b5   : > { %932 = vst [vmem:[%s1742_s26 + $0xc8] sm:$0xff] %v900_v49  ;;  %v726_v53 = vadd.f32 %v725_v51, %v1731_v11  ;;  %v775_v54 = vadd.f32 %v774_v52, %v1733_v12 }
 0x1b7   : > { %v1370_v55 = vpop.eup %1369  ;;  %v807_v56 = vmul.f32 0.5, %v726_v53  ;;  %v808_v57 = vmul.f32 0.5, %v775_v54 }
 0x1b8   : > { %v1372_v58 = vpop.eup %1371  ;;  %v869_v59 = vmul.f32 2.0, %v1370_v55 }
 0x1b9   : > { %v870_v60 = vmul.f32 2.0, %v1372_v58  ;;  %1373 = vtanh.f32 %v807_v56 }
 0x1ba   : > { %v901_v61 = vadd.f32 3.0, %v869_v59  ;;  %1375 = vtanh.f32 %v808_v57 }
 0x1bb   : > { %v902_v62 = vadd.f32 3.0, %v870_v60 }
 0x1bc   : > { %933 = vst [vmem:[%s1742_s26 + $0xd0] sm:$0xff] %v901_v61  ;;  %v727_v63 = vpop.f32.mrf.mxu2  ;;  %v776_v0 = vpop.f32.mrf.mxu3 }
 0x1bd   : > { %934 = vst [vmem:[%s1742_s26 + $0xd8] sm:$0xff] %v902_v62  ;;  %v728_v1 = vadd.f32 %v727_v63, %v1731_v11  ;;  %v777_v2 = vadd.f32 %v776_v0, %v1733_v12 }
 0x1bf   : > { %v1374_v3 = vpop.eup %1373  ;;  %v809_v4 = vmul.f32 0.5, %v728_v1  ;;  %v810_v5 = vmul.f32 0.5, %v777_v2 }
 0x1c0   : > { %v1376_v6 = vpop.eup %1375  ;;  %v871_v7 = vmul.f32 2.0, %v1374_v3 }
 0x1c1   : > { %v872_v8 = vmul.f32 2.0, %v1376_v6  ;;  %1377 = vtanh.f32 %v809_v4 }
 0x1c2   : > { %v903_v9 = vadd.f32 3.0, %v871_v7  ;;  %1379 = vtanh.f32 %v810_v5 }
 0x1c3   : > { %v904_v10 = vadd.f32 3.0, %v872_v8 }
 0x1c4   : > { %935 = vst [vmem:[%s1742_s26 + $0xe0] sm:$0xff] %v903_v9 }
 0x1c5   : > { %936 = vst [vmem:[%s1742_s26 + $0xe8] sm:$0xff] %v904_v10 }
 0x1c7   : > { %v1378_v11 = vpop.eup %1377 }
 0x1c8   : > { %v1380_v12 = vpop.eup %1379  ;;  %v873_v13 = vmul.f32 2.0, %v1378_v11 }
 0x1c9   : > { %v874_v14 = vmul.f32 2.0, %v1380_v12 }
 0x1ca   : > { %v905_v50 = vadd.f32 3.0, %v873_v13 }
 0x1cb   : > { %v906_v15 = vadd.f32 3.0, %v874_v14 }
 0x1cc   : > { %937 = vst [vmem:[%s1742_s26 + $0xf0] sm:$0xff] %v905_v50 }
 0x1cd   : > { %938 = vst [vmem:[%s1742_s26 + $0xf8] sm:$0xff] %v906_v15 }
 0x1ce   : > { %1408 = shalt.err (!%p1405_p3)
}
 0x1cf   : > { %s1445_s23 = smov 256   ;;  %s1446_s25 = smov 16  }
 0x1d0   : > { %1275 = dma.vmem_to_hbm [thread:$0]  (%p1515_p5), %s954_s9, 4096, %s956_s10, %s940_s22, %s1445_s23, %s1445_s23, %s1446_s25  }
 0x1d1 PF: > { %p1281_p4 = scmp.ge.s32.totalorder %s1443_s21, 2  ;;  %s970_s26 = sand.u32 1, %s1431_s18  }
 0x1d2   : > { %s971_s30 = scalar_lea.sflag [#allocation3], %s970_s26 }
 0x1d3   : > { %p1278_p7 = pnand %p1281_p4, %p1519_p6 }
 0x1d5   : > { %p1279_p8 = pneg %p1278_p7 }
 0x1d7   : > { %1426 = dma.done.wait (%p1279_p8), %s971_s30, 4096  }
 0x1d8   : > { %1428 = vsyncadd (%p1279_p8), %s971_s30, 4294963200  ;;  %p15_p9 = scmp.ge.s32.totalorder %s1502_s24, 4   ;;  %s1846_s18 = smov %s1435_s19 }
 0x1d9   : > { %s1847_s19 = smov %s1439_s20  ;;  %s1848_s20 = smov %s1513_s27 }
 0x1da   : > { %s1849_s21 = smov %s1502_s24  ;;  %17 = sbr.rel (!%p15_p9) target bundleno = 3 (0x3), region = 75 }
 0x1df   :  { %977 = vsyncpa [#allocation3], 1 }
 0x1e0   :  { %979 = vsyncpa [#allocation3 + $0x1], 1 }

</bundles_post_ra>
